<compile_context>
chip_gen: v5e
topology: v5e:2x2
jax: 0.10.0
libtpu: 0.0.40
codegen_flags: <defaults>
</compile_context>

<pallas_src>
import jax
import jax.numpy as jnp
from jax import lax
from jax.experimental import pallas as pl
from jax.experimental.pallas import tpu as pltpu

EPS = 1e-12  # matches torch.nn.functional.normalize default eps


def _netvlad_kernel(x_ref, w_ref, c_ref, o_ref, agg_ref, ssum_ref):
    # x_ref:   (block_n, C, HW_tile)  channels on sublanes, spatial on lanes
    # w_ref:   (K, C)  1x1-conv weight;  c_ref: (K, C) centroids
    # o_ref:   (block_n, K, C)  intra+globally normalized vlad_global block
    # agg_ref: (block_n, K, C) f32 scratch accumulator over HW tiles
    # ssum_ref:(block_n, K, 1) f32 scratch accumulator over HW tiles
    hw_idx = pl.program_id(1)
    n_hw = pl.num_programs(1)
    nb, C, hw_t = x_ref.shape
    K = w_ref.shape[0]

    @pl.when(hw_idx == 0)
    def _init():
        agg_ref[...] = jnp.zeros_like(agg_ref)
        ssum_ref[...] = jnp.zeros_like(ssum_ref)

    # Hoisted (loop-invariant) operands.
    w_b = w_ref[...].astype(jnp.bfloat16)                # [K, C]   MXU feed
    ones_hw = jnp.ones((hw_t, 1), jnp.bfloat16)          # for assignment sums

    def body(i, carry):
        x = x_ref[i].astype(jnp.float32)                 # [C, hw_t]

        # --- descriptor-wise L2 normalization over C (sublane reduction) ---
        sumsq = jnp.sum(x * x, axis=0, keepdims=True)    # [1, hw_t]
        xn = x * lax.rsqrt(jnp.maximum(sumsq, EPS * EPS))
        xn_b = xn.astype(jnp.bfloat16)                   # MXU feed (halved vregs)

        # --- 1x1 conv == [K,C] @ [C,hw_t]; softmax over K (sublane axis) ---
        logits = jnp.dot(w_b, xn_b, preferred_element_type=jnp.float32)  # [K,hw_t]
        m = jnp.max(logits, axis=0, keepdims=True)
        e = jnp.exp(logits - m)
        denom = jnp.sum(e, axis=0, keepdims=True)
        sa = e * pl.reciprocal(denom, approx=True)       # [K, hw_t]
        sa_b = sa.astype(jnp.bfloat16)

        # --- partial sums over this HW tile (contraction on MXU) ---
        agg = lax.dot_general(sa_b, xn_b, (((1,), (1,)), ((), ())),
                              preferred_element_type=jnp.float32)  # [K, C]
        ss = jnp.dot(sa_b, ones_hw,
                     preferred_element_type=jnp.float32)           # [K, 1]
        agg_ref[i] = agg_ref[i] + agg
        ssum_ref[i] = ssum_ref[i] + ss
        return carry

    lax.fori_loop(0, nb, body, 0, unroll=True)

    @pl.when(hw_idx == n_hw - 1)
    def _finalize():
        cent = c_ref[...].astype(jnp.float32)                       # [K, C]
        vlad = agg_ref[...] - cent[None, :, :] * ssum_ref[...]      # [nb, K, C]

        # --- intra-normalization over C (per cluster) ---
        row_sumsq = jnp.sum(vlad * vlad, axis=2, keepdims=True)     # [nb, K, 1]
        vlad = vlad * lax.rsqrt(jnp.maximum(row_sumsq, EPS * EPS))

        # --- final L2 normalization over the flattened K*C vector ---
        g_sumsq = jnp.sum(vlad * vlad, axis=(1, 2), keepdims=True)  # [nb, 1, 1]
        vlad = vlad * lax.rsqrt(jnp.maximum(g_sumsq, EPS * EPS))

        # Single dense store of the whole block (no masked per-cluster stores).
        o_ref[...] = vlad.astype(o_ref.dtype)


def _pick_hw_tile(HW, max_tile=2048):
    """Largest multiple-of-128 divisor of HW no larger than max_tile; else HW."""
    if HW <= max_tile:
        return HW
    for t in range(max_tile, 127, -128):
        if t % 128 == 0 and HW % t == 0:
            return t
    # TODO(synk): pad HW to a multiple of 128 (with masked tail) instead of
    #             falling back to a full-HW resident block for awkward sizes.
    return HW


def patch_netvlad_global(x_nchw, conv_weight, centroids, *,
                         block_n=None, hw_tile=None):
    """x_nchw: [N, C, H, W]; conv_weight, centroids: [K, C]. Returns [N, K*C]."""
    N, C, H, W = x_nchw.shape
    K = conv_weight.shape[0]
    HW = H * W

    # NCHW -> [N, C, HW]: pure trailing-dim merge, no transpose pass.
    x = x_nchw.reshape(N, C, HW)

    # Batch several images per grid step (amortizes per-step overhead on the
    # single-TC v5e/v6e) while keeping >= 2 "parallel" steps for v7x's 2 TCs.
    if block_n is None:
        block_n = max(1, min(8, -(-N // 2)))
    n_pad = (-N) % block_n
    if n_pad:
        x = jnp.pad(x, ((0, n_pad), (0, 0), (0, 0)))
    n_total = N + n_pad

    if hw_tile is None:
        hw_tile = _pick_hw_tile(HW)
    n_hw = HW // hw_tile
    grid = (n_total // block_n, n_hw)

    itemsize = jnp.dtype(x.dtype).itemsize
    cost = pl.CostEstimate(
        flops=int(N * (4 * K * C * HW + 2 * K * HW + 3 * C * HW)),
        transcendentals=int(N * (K * HW + 2 * HW)),
        bytes_accessed=int(N * C * HW * itemsize + 2 * K * C * 4
                           + N * K * C * itemsize),
    )

    # Explicit VMEM budget: double-buffered input + output blocks + scratch,
    # with headroom, clamped to what every generation (incl. v7x) can hold.
    in_block = block_n * C * hw_tile * itemsize
    out_block = block_n * K * C * itemsize
    scratch_b = block_n * K * C * 4 + block_n * K * 128 * 4
    params_b = 2 * (2 * K * C * 4)
    needed = 2 * in_block + 2 * out_block + scratch_b + params_b
    vmem_limit = int(min(64 << 20, max(32 << 20, 4 * needed)))

    out = pl.pallas_call(
        _netvlad_kernel,
        out_shape=jax.ShapeDtypeStruct((n_total, K, C), x.dtype),
        grid_spec=pltpu.PrefetchScalarGridSpec(
            num_scalar_prefetch=0,
            grid=grid,
            in_specs=[
                pl.BlockSpec((block_n, C, hw_tile), lambda b, h: (b, 0, h)),
                pl.BlockSpec((K, C), lambda b, h: (0, 0)),
                pl.BlockSpec((K, C), lambda b, h: (0, 0)),
            ],
            out_specs=pl.BlockSpec((block_n, K, C), lambda b, h: (b, 0, 0)),
            scratch_shapes=[
                pltpu.VMEM((block_n, K, C), jnp.float32),
                pltpu.VMEM((block_n, K, 1), jnp.float32),
            ],
        ),
        compiler_params=pltpu.CompilerParams(
            dimension_semantics=("parallel", "arbitrary"),
            vmem_limit_bytes=vmem_limit,
        ),
        cost_estimate=cost,
    )(x, conv_weight, centroids)

    # Trailing-dim merge only (K-major, C-minor), matches torch .view(N, -1).
    return out[:N].reshape(N, K * C)


def _reference_forward(x_nchw, conv_weight, centroids):
    """Pure-JAX re-implementation of the PyTorch forward (vlad_global path)."""
    N, C, H, W = x_nchw.shape
    K = conv_weight.shape[0]
    norm = jnp.sqrt(jnp.sum(x_nchw * x_nchw, axis=1, keepdims=True))
    xn = x_nchw / jnp.maximum(norm, EPS)
    sa = jnp.einsum('nchw,kc->nkhw', xn, conv_weight)
    sa = jax.nn.softmax(sa, axis=1)
    resid = xn[:, None, :, :, :] - centroids[None, :, :, None, None]
    resid = resid * sa[:, :, None, :, :]
    vlad = resid.reshape(N, K, C, -1).sum(axis=-1)
    vlad = vlad / jnp.maximum(
        jnp.linalg.norm(vlad, axis=2, keepdims=True), EPS)
    vlad = vlad.reshape(N, -1)
    vlad = vlad / jnp.maximum(
        jnp.linalg.norm(vlad, axis=1, keepdims=True), EPS)
    return vlad


if __name__ == "__main__":
    # Small shapes consistent with the module: dim (=C) = 32, num_clusters = 8
    N, C, H, W = 2, 32, 16, 16
    K = 8

    key = jax.random.PRNGKey(0)
    kx, kw, kc = jax.random.split(key, 3)

    x = jax.random.normal(kx, (N, C, H, W), dtype=jnp.float32)
    # nn.Conv2d(dim, num_clusters, 1, bias=False) weight -> [K, C] (1x1 squeezed)
    conv_weight = 0.1 * jax.random.normal(kw, (K, C), dtype=jnp.float32)
    # centroids = torch.rand(K, C) -> uniform [0, 1)
    centroids = jax.random.uniform(kc, (K, C), dtype=jnp.float32)

    out = patch_netvlad_global(x, conv_weight, centroids)
    out = jax.block_until_ready(out)

    ref = _reference_forward(x, conv_weight, centroids)
    assert out.shape == (N, K * C), out.shape
    assert bool(jnp.all(jnp.isfinite(out)))
    assert bool(jnp.allclose(out, ref, atol=1e-2, rtol=1e-2)), (
        float(jnp.max(jnp.abs(out - ref))))

    print("KERNEL_OK")
</pallas_src>

<mosaic_0001>
module attributes {stable_mosaic.version = 11 : i64} {
  func.func @_netvlad_kernel(%arg0: i32, %arg1: i32, %arg2: memref<1x32x256xf32, #tpu.memory_space<vmem>>, %arg3: memref<8x32xf32, #tpu.memory_space<vmem>>, %arg4: memref<8x32xf32, #tpu.memory_space<vmem>>, %arg5: memref<1x8x32xf32, #tpu.memory_space<vmem>>, %arg6: memref<1x8x32xf32, #tpu.memory_space<vmem>>, %arg7: memref<1x8x1xf32, #tpu.memory_space<vmem>>) attributes {dimension_semantics = [#tpu.dimension_semantics<parallel>, #tpu.dimension_semantics<arbitrary>], iteration_bounds = array<i64: 2, 1>, scalar_prefetch = 0 : i64, scratch_operands = 2 : i64, tpu.core_type = #tpu.core_type<tc>, window_params = [{transform_indices = @transform_0, window_bounds = array<i64: 1, 32, 256>}, {pipeline_mode = #tpu.pipeline_mode<synchronous>, transform_indices = @transform_1, window_bounds = array<i64: 8, 32>}, {pipeline_mode = #tpu.pipeline_mode<synchronous>, transform_indices = @transform_2, window_bounds = array<i64: 8, 32>}, {transform_indices = @transform_3, window_bounds = array<i64: 1, 8, 32>}]} {
    %c0_i32 = arith.constant 0 : i32
    %0 = arith.cmpi eq, %arg1, %c0_i32 : i32
    %1 = arith.extui %0 : i1 to i32
    %c0_i32_0 = arith.constant 0 : i32
    %2 = arith.cmpi ne, %1, %c0_i32_0 : i32
    scf.if %2 {
      %cst_22 = arith.constant 0.000000e+00 : f32
      %51 = vector.broadcast %cst_22 : f32 to vector<1x8x32xf32>
      %c0_23 = arith.constant 0 : index
      %c0_24 = arith.constant 0 : index
      %c0_25 = arith.constant 0 : index
      %52 = vector.load %arg6[%c0_23, %c0_24, %c0_25] : memref<1x8x32xf32, #tpu.memory_space<vmem>>, vector<1x8x32xf32>
      tpu.vector_store %arg6[%c0_23, %c0_24, %c0_25], %51 {strides = array<i32>} : memref<1x8x32xf32, #tpu.memory_space<vmem>>, vector<1x8x32xf32>,
      %cst_26 = arith.constant 0.000000e+00 : f32
      %53 = vector.broadcast %cst_26 : f32 to vector<1x8x1xf32>
      %c0_27 = arith.constant 0 : index
      %c0_28 = arith.constant 0 : index
      %c0_29 = arith.constant 0 : index
      %54 = vector.load %arg7[%c0_27, %c0_28, %c0_29] : memref<1x8x1xf32, #tpu.memory_space<vmem>>, vector<1x8x1xf32>
      tpu.vector_store %arg7[%c0_27, %c0_28, %c0_29], %53 {strides = array<i32>} : memref<1x8x1xf32, #tpu.memory_space<vmem>>, vector<1x8x1xf32>,
    } else {
    }
    %c0 = arith.constant 0 : index
    %c0_1 = arith.constant 0 : index
    %3 = vector.load %arg3[%c0, %c0_1] : memref<8x32xf32, #tpu.memory_space<vmem>>, vector<8x32xf32>
    %4 = arith.truncf %3 : vector<8x32xf32> to vector<8x32xbf16>
    %cst = arith.constant 1.000000e+00 : bf16
    %5 = vector.broadcast %cst : bf16 to vector<256x1xbf16>
    %c0_i32_2 = arith.constant 0 : i32
    %6 = arith.index_cast %c0_i32_2 : i32 to index
    %c0_3 = arith.constant 0 : index
    %c0_4 = arith.constant 0 : index
    %7 = vector.load %arg2[%6, %c0_3, %c0_4] : memref<1x32x256xf32, #tpu.memory_space<vmem>>, vector<1x32x256xf32>
    %8 = vector.shape_cast %7 : vector<1x32x256xf32> to vector<32x256xf32>
    %9 = arith.mulf %8, %8 : vector<32x256xf32>
    %cst_5 = arith.constant dense<0.000000e+00> : vector<256xf32>
    %10 = vector.multi_reduction <add>, %9, %cst_5 [0] : vector<32x256xf32> to vector<256xf32>
    %11 = vector.shape_cast %10 : vector<256xf32> to vector<1x256xf32>
    %cst_6 = arith.constant 1.000000e-24 : f32
    %12 = vector.broadcast %cst_6 : f32 to vector<1x256xf32>
    %13 = arith.maximumf %11, %12 : vector<1x256xf32>
    %14 = math.rsqrt %13 : vector<1x256xf32>
    %15 = vector.broadcast %14 : vector<1x256xf32> to vector<32x256xf32>
    %16 = arith.mulf %8, %15 : vector<32x256xf32>
    %17 = arith.truncf %16 : vector<32x256xf32> to vector<32x256xbf16>
    %cst_7 = arith.constant dense<0.000000e+00> : vector<8x256xf32>
    %18 = tpu.matmul %4, %17, %cst_7 {dimension_numbers = #tpu.dot_dimension_numbers<[1], [0], [0], [1], [0, 0, 1, 1], [], []>} : vector<8x32xbf16>, vector<32x256xbf16>, vector<8x256xf32> -> vector<8x256xf32>
    %cst_8 = arith.constant dense<0xFF800000> : vector<256xf32>
    %19 = vector.multi_reduction <maximumf>, %18, %cst_8 [0] : vector<8x256xf32> to vector<256xf32>
    %20 = vector.shape_cast %19 : vector<256xf32> to vector<1x256xf32>
    %21 = vector.broadcast %20 : vector<1x256xf32> to vector<8x256xf32>
    %22 = arith.subf %18, %21 : vector<8x256xf32>
    %23 = math.exp %22 : vector<8x256xf32>
    %cst_9 = arith.constant dense<0.000000e+00> : vector<256xf32>
    %24 = vector.multi_reduction <add>, %23, %cst_9 [0] : vector<8x256xf32> to vector<256xf32>
    %25 = vector.shape_cast %24 : vector<256xf32> to vector<1x256xf32>
    %26 = tpu.reciprocal %25 {approx = true} : vector<1x256xf32> -> vector<1x256xf32>
    %27 = vector.broadcast %26 : vector<1x256xf32> to vector<8x256xf32>
    %28 = arith.mulf %23, %27 : vector<8x256xf32>
    %29 = arith.truncf %28 : vector<8x256xf32> to vector<8x256xbf16>
    %cst_10 = arith.constant dense<0.000000e+00> : vector<8x32xf32>
    %30 = tpu.matmul %29, %17, %cst_10 {dimension_numbers = #tpu.dot_dimension_numbers<[1], [1], [0], [0], [0, 0, 1, 0], [], []>} : vector<8x256xbf16>, vector<32x256xbf16>, vector<8x32xf32> -> vector<8x32xf32>
    %cst_11 = arith.constant dense<0.000000e+00> : vector<8x1xf32>
    %31 = tpu.matmul %29, %5, %cst_11 {dimension_numbers = #tpu.dot_dimension_numbers<[1], [0], [0], [1], [0, 0, 1, 1], [], []>} : vector<8x256xbf16>, vector<256x1xbf16>, vector<8x1xf32> -> vector<8x1xf32>
    %32 = arith.index_cast %c0_i32_2 : i32 to index
    %c0_12 = arith.constant 0 : index
    %c0_13 = arith.constant 0 : index
    %33 = vector.load %arg6[%32, %c0_12, %c0_13] : memref<1x8x32xf32, #tpu.memory_space<vmem>>, vector<1x8x32xf32>
    %34 = vector.shape_cast %33 : vector<1x8x32xf32> to vector<8x32xf32>
    %35 = arith.addf %34, %30 : vector<8x32xf32>
    %36 = arith.index_cast %c0_i32_2 : i32 to index
    %c0_14 = arith.constant 0 : index
    %c0_15 = arith.constant 0 : index
    %37 = vector.load %arg6[%36, %c0_14, %c0_15] : memref<1x8x32xf32, #tpu.memory_space<vmem>>, vector<1x8x32xf32>
    %38 = vector.shape_cast %37 : vector<1x8x32xf32> to vector<8x32xf32>
    %39 = vector.shape_cast %35 : vector<8x32xf32> to vector<1x8x32xf32>
    tpu.vector_store %arg6[%36, %c0_14, %c0_15], %39 {strides = array<i32>} : memref<1x8x32xf32, #tpu.memory_space<vmem>>, vector<1x8x32xf32>,
    %40 = arith.index_cast %c0_i32_2 : i32 to index
    %c0_16 = arith.constant 0 : index
    %c0_17 = arith.constant 0 : index
    %41 = vector.load %arg7[%40, %c0_16, %c0_17] : memref<1x8x1xf32, #tpu.memory_space<vmem>>, vector<1x8x1xf32>
    %42 = vector.shape_cast %41 : vector<1x8x1xf32> to vector<8x1xf32>
    %43 = arith.addf %42, %31 : vector<8x1xf32>
    %44 = arith.index_cast %c0_i32_2 : i32 to index
    %c0_18 = arith.constant 0 : index
    %c0_19 = arith.constant 0 : index
    %45 = vector.load %arg7[%44, %c0_18, %c0_19] : memref<1x8x1xf32, #tpu.memory_space<vmem>>, vector<1x8x1xf32>
    %46 = vector.shape_cast %45 : vector<1x8x1xf32> to vector<8x1xf32>
    %47 = vector.shape_cast %43 : vector<8x1xf32> to vector<1x8x1xf32>
    tpu.vector_store %arg7[%44, %c0_18, %c0_19], %47 {strides = array<i32>} : memref<1x8x1xf32, #tpu.memory_space<vmem>>, vector<1x8x1xf32>,
    %c1_i32 = arith.constant 1 : i32
    %c0_i32_20 = arith.constant 0 : i32
    %48 = arith.cmpi eq, %arg1, %c0_i32_20 : i32
    %49 = arith.extui %48 : i1 to i32
    %c0_i32_21 = arith.constant 0 : i32
    %50 = arith.cmpi ne, %49, %c0_i32_21 : i32
    scf.if %50 {
      %c0_22 = arith.constant 0 : index
      %c0_23 = arith.constant 0 : index
      %51 = vector.load %arg4[%c0_22, %c0_23] : memref<8x32xf32, #tpu.memory_space<vmem>>, vector<8x32xf32>
      %c0_24 = arith.constant 0 : index
      %c0_25 = arith.constant 0 : index
      %c0_26 = arith.constant 0 : index
      %52 = vector.load %arg6[%c0_24, %c0_25, %c0_26] : memref<1x8x32xf32, #tpu.memory_space<vmem>>, vector<1x8x32xf32>
      %53 = vector.shape_cast %51 : vector<8x32xf32> to vector<1x8x32xf32>
      %c0_27 = arith.constant 0 : index
      %c0_28 = arith.constant 0 : index
      %c0_29 = arith.constant 0 : index
      %54 = vector.load %arg7[%c0_27, %c0_28, %c0_29] : memref<1x8x1xf32, #tpu.memory_space<vmem>>, vector<1x8x1xf32>
      %55 = vector.broadcast %54 : vector<1x8x1xf32> to vector<1x8x32xf32>
      %56 = arith.mulf %53, %55 : vector<1x8x32xf32>
      %57 = arith.subf %52, %56 : vector<1x8x32xf32>
      %58 = arith.mulf %57, %57 : vector<1x8x32xf32>
      %cst_30 = arith.constant dense<0.000000e+00> : vector<1x8xf32>
      %59 = vector.multi_reduction <add>, %58, %cst_30 [2] : vector<1x8x32xf32> to vector<1x8xf32>
      %60 = vector.shape_cast %59 : vector<1x8xf32> to vector<1x8x1xf32>
      %cst_31 = arith.constant 1.000000e-24 : f32
      %61 = vector.broadcast %cst_31 : f32 to vector<1x8x1xf32>
      %62 = arith.maximumf %60, %61 : vector<1x8x1xf32>
      %63 = math.rsqrt %62 : vector<1x8x1xf32>
      %64 = vector.broadcast %63 : vector<1x8x1xf32> to vector<1x8x32xf32>
      %65 = arith.mulf %57, %64 : vector<1x8x32xf32>
      %66 = arith.mulf %65, %65 : vector<1x8x32xf32>
      %cst_32 = arith.constant dense<0.000000e+00> : vector<1xf32>
      %67 = vector.multi_reduction <add>, %66, %cst_32 [1, 2] : vector<1x8x32xf32> to vector<1xf32>
      %68 = vector.shape_cast %67 : vector<1xf32> to vector<1x1x1xf32>
      %cst_33 = arith.constant 1.000000e-24 : f32
      %69 = vector.broadcast %cst_33 : f32 to vector<1x1x1xf32>
      %70 = arith.maximumf %68, %69 : vector<1x1x1xf32>
      %71 = math.rsqrt %70 : vector<1x1x1xf32>
      %72 = vector.broadcast %71 : vector<1x1x1xf32> to vector<1x8x32xf32>
      %73 = arith.mulf %65, %72 : vector<1x8x32xf32>
      %c0_34 = arith.constant 0 : index
      %c0_35 = arith.constant 0 : index
      %c0_36 = arith.constant 0 : index
      %74 = vector.load %arg5[%c0_34, %c0_35, %c0_36] : memref<1x8x32xf32, #tpu.memory_space<vmem>>, vector<1x8x32xf32>
      tpu.vector_store %arg5[%c0_34, %c0_35, %c0_36], %73 {strides = array<i32>} : memref<1x8x32xf32, #tpu.memory_space<vmem>>, vector<1x8x32xf32>,
    } else {
    }
    return
  }
  func.func @transform_0(%arg0: i32, %arg1: i32) -> (i32, i32, i32) {
    %c0_i32 = arith.constant 0 : i32
    %c0_i32_0 = arith.constant 0 : i32
    return %arg0, %c0_i32, %arg1 : i32, i32, i32
  }
  func.func @transform_1(%arg0: i32, %arg1: i32) -> (i32, i32) {
    %c0_i32 = arith.constant 0 : i32
    %c0_i32_0 = arith.constant 0 : i32
    %c0_i32_1 = arith.constant 0 : i32
    return %c0_i32, %c0_i32_0 : i32, i32
  }
  func.func @transform_2(%arg0: i32, %arg1: i32) -> (i32, i32) {
    %c0_i32 = arith.constant 0 : i32
    %c0_i32_0 = arith.constant 0 : i32
    %c0_i32_1 = arith.constant 0 : i32
    return %c0_i32, %c0_i32_0 : i32, i32
  }
  func.func @transform_3(%arg0: i32, %arg1: i32) -> (i32, i32, i32) {
    %c0_i32 = arith.constant 0 : i32
    %c0_i32_0 = arith.constant 0 : i32
    %c0_i32_1 = arith.constant 0 : i32
    return %arg0, %c0_i32, %c0_i32_0 : i32, i32, i32
  }
}

</mosaic_0001>

<bundles_post_ra>
// kernel: tpu_custom_call.1
= control target key start
LH: loop header
LB: loop body
LE: loop exit
PB: predicated region body
PF: predicated region fallthrough
CT: control target
= control target key end

     0   :  { %s1103_s0 = inlined_call_operand.hbm [shape: f32[2,32,256], index: 0, kind: input, shape index: {}]   ;;  %s1104_s1 = inlined_call_operand.hbm [shape: f32[8,32], index: 1, kind: input, shape index: {}]   ;;  %s1105_s2 = inlined_call_operand.hbm [shape: f32[8,32], index: 2, kind: input, shape index: {}]   ;;  %s1106_s3 = inlined_call_operand.hbm [shape: f32[2,8,32], index: 3, kind: output, shape index: {}]  }
   0x1   :  { %1107 = sst [smem:[#allocation14_spill]] %s1104_s1 }
   0x2   :  { %8 = vsyncpa [#allocation5], 0 }
   0x3   :  { %10 = vsyncpa [#allocation5 + $0x1], 0 }
   0x4   :  { %11 = vsyncpa [#allocation8], 0 }
   0x5   :  { %12 = vsyncpa [#allocation6], 0 }
   0x6   :  { %14 = vsyncpa [#allocation6 + $0x1], 0  ;;  %s941_s12 = smov 0   ;;  %s943_s13 = smov 0  }
   0x7   :  { %s945_s14 = smov 0   ;;  %s947_s15 = smov 0  }
   0x8   :  { %s949_s16 = smov 0   ;;  %s951_s17 = smov 0  }
   0x9 LB: > { %s610_s18 = sadd.s32 4294967295, %s912_s17   ;;  %s611_s19 = sadd.s32 4294967294, %s912_s17   ;;  %s912_s17 = sphi %s951_s17, %s20_s17   ;;  %s908_s16 = sphi %s949_s16, %s1120_s16   ;;  %s904_s15 = sphi %s947_s15, %s1119_s15   ;;  %s900_s14 = sphi %s945_s14, %s1118_s14   ;;  %s896_s13 = sphi %s943_s13, %s1117_s13   ;;  %s892_s12 = sphi %s941_s12, %s1116_s12  }
   0xa   : > { %s41_s20 = sadd.s32 1, %s900_s14  ;;  %p48_p0 = scmp.ne.s32.totalorder %s900_s14, %s896_s13 }
   0xb   : > { %p49_p1 = scmp.eq.s32.totalorder %s912_s17, 0  ;;  %p54_p2 = scmp.ne.s32.totalorder %s896_s13, %s892_s12 }
   0xc   : > { %p979_p3 = scmp.eq.s32.totalorder %s610_s18, 0  ;;  %p120_p4 = scmp.eq.s32.totalorder %s610_s18, 1 }
   0xd   : > { %p983_p5 = por %p49_p1, %p48_p0  ;;  %p126_p6 = scmp.eq.s32.totalorder %s611_s19, 1 }
   0xe   : > { %p989_p7 = por %p979_p3, %p54_p2  ;;  %p993_p8 = por %p120_p4, %p48_p0 }
   0xf   : > { %p997_p9 = por %p126_p6, %p54_p2  ;;  %p612_p10 = scmp.ge.s32.totalorder %s912_s17, 1 }
  0x10   : > { %p133_p11 = scmp.lt.s32.totalorder %s912_s17, 3  ;;  %s1113_s1 = sld [smem:[#allocation14_spill]] }
  0x11   : > { %s914_s30 = smov [#allocation7]   ;;  %p615_p13 = scmp.ge.s32.totalorder %s912_s17, 2 }
  0x12   : > { %p1006_p12 = pnand %p612_p10, %p133_p11  ;;  %s147_s4 = sshll.u32 %s914_s30, 4  ;;  %s148_s4 = int_to_ptr.vmem [resolvable:$true] %s147_s4 }
  0x13   : > { %p660_p1 = scmp.lt.s32.totalorder %s912_s17, 2  ;;  %s157_s7 = sshll.u32 %s1105_s2, 4  ;;  %s158_s7 = int_to_ptr.hbm [resolvable:$true] %s157_s7 }
  0x14   : > { %p643_p0 = pneg %p1006_p12  ;;  %s915_s9 = smov [#allocation9]  }
  0x15   : > { %p1021_p4 = pnand %p660_p1, %p983_p5  ;;  %s159_s10 = sshll.u32 %s915_s9, 4  ;;  %s160_s10 = int_to_ptr.vmem [resolvable:$true] %s159_s10 }
  0x16   : > { %s145_s28 = sshll.u32 %s1113_s1, 4  ;;  %p644_p2 = pnand %p643_p0, %p979_p3  ;;  %s146_s28 = int_to_ptr.hbm [resolvable:$true] %s145_s28 }
  0x17   : > { %s170_s11 = sand.u32 1, %s900_s14   ;;  %s32_s18 = sadd.s32 1, %s908_s16 }
  0x18   : > { %646 = dma.hbm_to_vmem [thread:$0]  (!%p644_p2), %s146_s28, 128, %s148_s4, [#allocation8]  }
  0x19   : > { %649 = dma.hbm_to_vmem [thread:$0]  (!%p644_p2), %s158_s7, 128, %s160_s10, [#allocation8]  }
  0x1a   : > { %s616_s19 = sshll.u32 %s170_s11, 6  ;;  %p34_p6 = scmp.ge.s32.totalorder %s32_s18, 2 }
  0x1b   : > { %s630_s26 = sshll.u32 %s908_s16, 6  ;;  %s174_s27 = scalar_lea.vmem [#allocation4], %s616_s19 }
  0x1c   : > { %s184_s22 = sshll.u32 %s174_s27, 4  ;;  %s1122_s18 = smov (%p34_p6, %s32_s18), 0  ;;  %s185_s22 = int_to_ptr.vmem [resolvable:$true] %s184_s22 }
  0x1d   : > { %s181_s6 = scalar_lea.hbm %s1103_s0, %s630_s26  ;;  %s36_s28 = ssub.s32 %s908_s16, %s1122_s18 }
  0x1e   : > { %s182_s4 = sshll.u32 %s181_s6, 4  ;;  %p39_p5 = scmp.eq.s32.totalorder %s36_s28, 0  ;;  %s183_s4 = int_to_ptr.hbm [resolvable:$true] %s182_s4 }
  0x1f   : > { %s171_s9 = scalar_lea.sflag [#allocation5], %s170_s11  ;;  %s916_s10 = smov 256  }
  0x20   : > { %s1038_s7 = scalar_select %p39_p5, %s900_s14, %s41_s20  }
  0x21   : > { %s917_s1 = smov 16   ;;  %196 = sbr.rel (%p1006_p12) target bundleno = 827 (0x33b), region = 32 }
  0x22   : > { %653 = dma.hbm_to_vmem [thread:$0]  (!%p1021_p4), %s183_s4, 1024, %s185_s22, %s171_s9, %s916_s10, %s916_s10, %s917_s1  }
  0x23   : > { %s1045_s19 = sand.u32 (!%p1006_p12), 1, %s896_s13  }
  0x24   : > { %s620_s26 = sshll.u32 (!%p1006_p12), %s1045_s19, 6  ;;  %s199_s27 = scalar_lea.sflag (!%p1006_p12), [#allocation5], %s1045_s19 }
  0x25   : > { %s202_s30 = scalar_lea.vmem (!%p1006_p12), [#allocation4], %s620_s26 }
  0x26   : > { %879 = dma.done.wait (%p989_p7), %s199_s27, 1024  }
  0x27   : > { %881 = vsyncadd (%p989_p7), %s199_s27, 4294966272 }
  0x28   : > { %883 = dma.done.wait (%p979_p3), [#allocation8], 256  }
  0x29   : > { %885 = vsyncadd (%p979_p3), [#allocation8], 4294967040  ;;  %v249_v0 = vld [vmem:[%s202_s30] sm:$0xff]  ;;  %v251_v1 = vld [vmem:[%s202_s30 + $0x10] sm:$0xff]  ;;  %vm243_vm6 = vcmask 261120   ;;  %vm245_vm7 = vcmask 7168  }
  0x2a   : > { %v253_v2 = vld [vmem:[%s202_s30 + $0x20] sm:$0xff]  ;;  %v255_v3 = vld [vmem:[%s202_s30 + $0x30] sm:$0xff]  ;;  %v257_v4 = vmul.f32 %v249_v0, %v249_v0  ;;  %v259_v5 = vmul.f32 %v251_v1, %v251_v1  ;;  %v250_v7 = vld [vmem:[%s202_s30 + $0x8] sm:$0xff]  ;;  %s623_s1 = sshll.u32 %s1045_s19, 3  ;;  %s627_s20 = sshll.u32 %s904_s15, 3 }
  0x2b   : > { %v261_v6 = vmul.f32 %v253_v2, %v253_v2  ;;  %v252_v8 = vld [vmem:[%s202_s30 + $0x18] sm:$0xff]  ;;  %v254_v9 = vld [vmem:[%s202_s30 + $0x28] sm:$0xff]  ;;  %v258_v11 = vmul.f32 %v250_v7, %v250_v7  ;;  %v263_v13 = vmul.f32 %v255_v3, %v255_v3  ;;  %v247_v61 = vld [vmem:[#allocation7] sm:$0xff]  ;;  %s505_s29 = scalar_lea.hbm %s1106_s3, %s627_s20  ;;  %s235_s8 = scalar_lea.vmem [#allocation10], %s623_s1 }
  0x2c   : > { %v256_v10 = vld [vmem:[%s202_s30 + $0x38] sm:$0xff]  ;;  %v260_v12 = vmul.f32 %v252_v8, %v252_v8  ;;  %v265_v14 = vadd.f32 %v259_v5, %v257_v4  ;;  %v262_v15 = vmul.f32 %v254_v9, %v254_v9  ;;  %v248_v63 = vpack.c.bf16 %v247_v61, %v247_v61  ;;  %s507_s11 = sshll.u32 %s235_s8, 4  ;;  %s509_s22 = sshll.u32 %s505_s29, 4  ;;  %s508_s11 = int_to_ptr.vmem [resolvable:$true] %s507_s11  ;;  %s510_s22 = int_to_ptr.hbm [resolvable:$true] %s509_s22 }
  0x2d   : > { %v264_v16 = vmul.f32 %v256_v10, %v256_v10  ;;  %s495_s15 = scalar_lea.sflag [#allocation6], %s1045_s19  ;;  %s840_s5 = sshra.s32 %s510_s22, 4  ;;  %s841_s5 = int_to_ptr.hbm [resolvable:$true] %s840_s5 }
  0x2e   : > { %v274_v17 = vadd.f32 %v260_v12, %v258_v11  ;;  %v266_v18 = vadd.f32 %v265_v14, %v261_v6  ;;  %s842_s6 = scalar_lea.hbm %s841_s5, 8  ;;  %s846_s9 = scalar_lea.hbm %s1106_s3, 16 }
  0x2f   : > { %p843_p3 = scmp.ne.s32.totalorder %s841_s5, %s842_s6  ;;  %p847_p11 = scmp.lt.s32.totalorder %s841_s5, %s1106_s3 }
  0x30   : > { %v275_v19 = vadd.f32 %v274_v17, %v262_v15  ;;  %v267_v20 = vadd.f32 %v266_v18, %v263_v13  ;;  %p848_p12 = scmp.lt.s32.totalorder %s846_s9, %s842_s6 }
  0x31   : > { %p844_p7 = pnand %p843_p3, %p993_p8 }
  0x32   : > { %v276_v21 = vadd.f32 %v275_v19, %v264_v16  ;;  %v268_v22 = vrot.slane %v267_v20, 4  ;;  %p849_p0 = por %p848_p12, %p847_p11 }
  0x33   : > { %p845_p10 = pneg %p844_p7 }
  0x34   : > { %v277_v23 = vrot.slane %v276_v21, 4  ;;  %v269_v24 = vadd.f32 %v268_v22, %v267_v20 }
  0x35   : > { %p850_p1 = pnand %p849_p0, %p845_p10 }
  0x36   : > { %v278_v25 = vadd.f32 %v277_v23, %v276_v21  ;;  %v270_v26 = vrot.slane %v269_v24, 2 }
  0x38   : > { %v279_v27 = vrot.slane %v278_v25, 2  ;;  %v271_v28 = vadd.f32 %v270_v26, %v269_v24 }
  0x3a   : > { %v280_v29 = vadd.f32 %v279_v27, %v278_v25  ;;  %v272_v30 = vrot.slane %v271_v28, 1 }
  0x3c   : > { %v281_v31 = vrot.slane %v280_v29, 1  ;;  %v273_v32 = vadd.f32 %v272_v30, %v271_v28 }
  0x3e   : > { %v282_v33 = vadd.f32 %v281_v31, %v280_v29  ;;  %v283_v34 = vmax.f32 %v273_v32, 1e-24 }
  0x40   : > { %v284_v35 = vmax.f32 %v282_v33, 1e-24  ;;  %720 = vrsqrt.f32 %v283_v34  ;;  %vm291_vm0 = vweird.f32 %v283_v34 }
  0x42   : > { %722 = vrsqrt.f32 %v284_v35  ;;  %vm301_vm2 = vweird.f32 %v284_v35 }
  0x46   : > { %v721_v36 = vpop.eup %720 }
  0x47   : > { %v286_v38 = vmul.f32 %v721_v36, %v283_v34  ;;  %vm292_vm1 = vweird.f32 %v721_v36 }
  0x48   : > { %v723_v37 = vpop.eup %722  ;;  %vm293_vm4 = vmor %vm291_vm0, %vm292_vm1 }
  0x49   : > { %v296_v39 = vmul.f32 %v723_v37, %v284_v35  ;;  %v287_v40 = vmul.f32 %v721_v36, %v286_v38  ;;  %vm302_vm3 = vweird.f32 %v723_v37 }
  0x4a   : > { %vm303_vm5 = vmor %vm301_vm2, %vm302_vm3 }
  0x4b   : > { %v297_v41 = vmul.f32 %v723_v37, %v296_v39  ;;  %v288_v42 = vmul.f32 0.5, %v287_v40 }
  0x4d   : > { %v298_v43 = vmul.f32 0.5, %v297_v41  ;;  %v289_v44 = vsub.f32 1.5, %v288_v42  ;;  %v919_v41 = vmov 0.0   ;;  %v920_v42 = vmov 0  }
  0x4e   : > { %246 = vst.msk [vmem:[#allocation3] sm:$0xff] %vm245_vm7, %v919_v41  ;;  %719 = vset.pattern.permute.xlu0 %v920_v42 }
  0x4f   : > { %v299_v45 = vsub.f32 1.5, %v298_v43  ;;  %v290_v46 = vmul.f32 %v721_v36, %v289_v44  ;;  %244 = vst.msk [vmem:[#allocation2] sm:$0xff] %vm243_vm6, %v919_v41 }
  0x51   : > { %v300_v47 = vmul.f32 %v723_v37, %v299_v45  ;;  %v294_v48 = vsel %vm293_vm4, %v721_v36, %v290_v46 }
  0x52   : > { %v309_v49 = vmul.f32 %v294_v48, %v253_v2  ;;  %v311_v50 = vmul.f32 %v294_v48, %v255_v3  ;;  %v305_v52 = vmul.f32 %v294_v48, %v249_v0  ;;  %v307_v55 = vmul.f32 %v294_v48, %v251_v1 }
  0x53   : > { %v304_v51 = vsel %vm303_vm5, %v723_v37, %v300_v47  ;;  %v918_v0 = vmov 1065369472  }
  0x54   : > { %v310_v53 = vmul.f32 %v304_v51, %v254_v9  ;;  %v312_v54 = vmul.f32 %v304_v51, %v256_v10  ;;  %v306_v56 = vmul.f32 %v304_v51, %v250_v7  ;;  %v315_v57 = vpack.c.bf16 %v311_v50, %v309_v49  ;;  %409 = vmatpush.bf16.msra.mxu0 %v918_v0 }
  0x55   : > { %v308_v58 = vmul.f32 %v304_v51, %v252_v8  ;;  %v313_v60 = vpack.c.bf16 %v307_v55, %v305_v52  ;;  %422 = vmatpush.bf16.msra.mxu1 %v918_v0  ;;  %v438_v45 = vld [vmem:[#allocation3] sm:$0xff] }
  0x56   : > { %v316_v59 = vpack.c.bf16 %v312_v54, %v310_v53  ;;  %327 = vmatpush.bf16.msra.mxu2 %v315_v57  ;;  %v435_v50 = vld [vmem:[#allocation2] sm:$0xff] }
  0x57   : > { %v314_v62 = vpack.c.bf16 %v308_v58, %v306_v56  ;;  %v445_v58 = vld [vmem:[#allocation9] sm:$0xff] }
  0x58   : > { %340 = vmatpush.bf16.msra.mxu3 %v316_v59  ;;  %410 = vmatpush.bf16.msra.mxu0 %v918_v0 }
  0x59   : > { %423 = vmatpush.bf16.msra.mxu1 %v918_v0 }
  0x5a   : > { %328 = vmatpush.bf16.msra.mxu2 %v313_v60 }
  0x5c   : > { %341 = vmatpush.bf16.msra.mxu3 %v314_v62  ;;  %411 = vmatpush.bf16.msra.mxu0 %v918_v0 }
  0x5d   : > { %624 = vmatmul.msk.bf16.vlgmr.msra.gmra.mxu2 %vm243_vm6, %v248_v63  ;;  %424 = vmatpush.bf16.msra.mxu1 %v918_v0 }
  0x5e   : > { %389 = vmatpush.bf16.xpose.msrb.mxu2 %v315_v57 }
  0x5f   : > { %625 = vmatmul.msk.bf16.vlgmr.msra.gmra.mxu3 %vm243_vm6, %v248_v63 }
  0x60   : > { %402 = vmatpush.bf16.xpose.msrb.mxu3 %v316_v59  ;;  %412 = vmatpush.bf16.msra.mxu0 %v918_v0 }
  0x61   : > { %425 = vmatpush.bf16.msra.mxu1 %v918_v0 }
  0x64   : > { %413 = vmatpush.bf16.msra.mxu0 %v918_v0 }
  0x65   : > { %426 = vmatpush.bf16.msra.mxu1 %v918_v0 }
  0x66   : > { %390 = vmatpush.bf16.xpose.msrb.mxu2 %v313_v60 }
  0x68   : > { %403 = vmatpush.bf16.xpose.msrb.mxu3 %v314_v62  ;;  %414 = vmatpush.bf16.msra.mxu0 %v918_v0 }
  0x69   : > { %427 = vmatpush.bf16.msra.mxu1 %v918_v0 }
  0x6c   : > { %415 = vmatpush.bf16.msra.mxu0 %v918_v0 }
  0x6d   : > { %428 = vmatpush.bf16.msra.mxu1 %v918_v0 }
  0x70   : > { %416 = vmatpush.bf16.msra.mxu0 %v918_v0 }
  0x71   : > { %429 = vmatpush.bf16.msra.mxu1 %v918_v0 }
  0xe0   : > { %v330_v1 = vpop.f32.mrf.mxu2 }
  0xe1   : > { %v347_v2 = vrot.slane %v330_v1, 4 }
  0xe2   : > { %v343_v3 = vpop.f32.mrf.mxu3 }
  0xe3   : > { %v353_v4 = vrot.slane %v343_v3, 4  ;;  %v348_v5 = vmax.f32 %v330_v1, %v347_v2 }
  0xe5   : > { %v354_v6 = vmax.f32 %v343_v3, %v353_v4  ;;  %v349_v7 = vrot.slane %v348_v5, 2 }
  0xe7   : > { %v355_v8 = vrot.slane %v354_v6, 2  ;;  %v350_v9 = vmax.f32 %v348_v5, %v349_v7 }
  0xe8   : > { %v332_v11 = vpop.f32.mrf.mxu2 }
  0xe9   : > { %v356_v10 = vmax.f32 %v354_v6, %v355_v8  ;;  %v351_v12 = vrot.slane %v350_v9, 1 }
  0xea   : > { %v345_v13 = vpop.f32.mrf.mxu3 }
  0xeb   : > { %v357_v14 = vrot.slane %v356_v10, 1  ;;  %v352_v15 = vmax.f32 %v350_v9, %v351_v12 }
  0xed   : > { %v358_v16 = vmax.f32 %v356_v10, %v357_v14  ;;  %v359_v17 = vsub.f32 %v330_v1, %v352_v15 }
  0xef   : > { %v360_v18 = vsub.f32 %v343_v3, %v358_v16  ;;  %v361_v19 = vmul.f32 1.442695, %v359_v17 }
  0xf1   : > { %v363_v20 = vmul.f32 1.442695, %v360_v18  ;;  %724 = vpow2.f32 %v361_v19 }
  0xf3   : > { %726 = vpow2.f32 %v363_v20 }
  0xf7   : > { %v725_v21 = vpop.eup %724 }
  0xf8   : > { %v365_v23 = vrot.slane %v725_v21, 4 }
  0xf9   : > { %v727_v22 = vpop.eup %726 }
  0xfa   : > { %v371_v24 = vrot.slane %v727_v22, 4  ;;  %v366_v25 = vadd.f32 %v725_v21, %v365_v23 }
  0xfc   : > { %v372_v26 = vadd.f32 %v727_v22, %v371_v24  ;;  %v367_v27 = vrot.slane %v366_v25, 2 }
  0xfe   : > { %v373_v28 = vrot.slane %v372_v26, 2  ;;  %v368_v29 = vadd.f32 %v367_v27, %v366_v25 }
 0x100   : > { %v374_v30 = vadd.f32 %v373_v28, %v372_v26  ;;  %v369_v31 = vrot.slane %v368_v29, 1 }
 0x102   : > { %v375_v32 = vrot.slane %v374_v30, 1  ;;  %v370_v33 = vadd.f32 %v369_v31, %v368_v29 }
 0x104   : > { %v376_v34 = vadd.f32 %v375_v32, %v374_v30  ;;  %728 = vrcp.f32 %v370_v33 }
 0x106   : > { %730 = vrcp.f32 %v376_v34 }
 0x10a   : > { %v729_v35 = vpop.eup %728 }
 0x10b   : > { %v379_v37 = vmul.f32 %v729_v35, %v725_v21 }
 0x10c   : > { %v731_v36 = vpop.eup %730 }
 0x10d   : > { %v380_v38 = vmul.f32 %v731_v36, %v727_v22  ;;  %v381_v39 = vpack.c.bf16 %v379_v37, %v379_v37 }
 0x10f   : > { %v382_v40 = vpack.c.bf16 %v380_v38, %v380_v38  ;;  %391 = vmatmul.bf16.vlgmr.msrb.gmra.mxu2 %v381_v39  ;;  %417 = vmatmul.bf16.vlgmr.msra.gmra.mxu0 %v381_v39 }
 0x111   : > { %404 = vmatmul.bf16.vlgmr.msrb.gmra.mxu3 %v382_v40  ;;  %430 = vmatmul.bf16.vlgmr.msra.gmra.mxu1 %v382_v40 }
 0x18c   : > { %v418_v43 = vpop.f32.mrf.mxu0 }
 0x18e   : > { %v431_v44 = vpop.f32.mrf.mxu1 }
 0x18f   : > { %v432_v46 = vadd.f32 %v431_v44, %v418_v43 }
 0x191   : > { %v439_v47 = vadd.f32 %v438_v45, %v432_v46 }
 0x192   : > { %v392_v48 = vpop.f32.mrf.mxu2 }
 0x193   : > { %441 = vst.msk [vmem:[#allocation3] sm:$0xff] %vm245_vm7, %v439_v47 }
 0x194   : > { %v405_v49 = vpop.f32.mrf.mxu3  ;;  %v420_v52 = vpop.f32.mrf.mxu0 }
 0x195   : > { %v406_v51 = vadd.f32 %v405_v49, %v392_v48 }
 0x196   : > { %v433_v53 = vpop.f32.mrf.mxu1 }
 0x197   : > { %v436_v54 = vadd.f32 %v435_v50, %v406_v51 }
 0x199   : > { %437 = vst.msk [vmem:[#allocation2] sm:$0xff] %vm243_vm6, %v436_v54 }
 0x19a   : > { %v447_v55 = vld [vmem:[#allocation3] sm:$0xff]  ;;  %v394_v56 = vpop.f32.mrf.mxu2 }
 0x19b   : > { %450 = vperm.xlu0 %719, %v447_v55  }
 0x19c   : > { %v407_v57 = vpop.f32.mrf.mxu3 }
 0x1a0   : > { %v446_v61 = vld [vmem:[#allocation2] sm:$0xff] }
 0x20d   : > { %v451_v59 = vpop.permute.xlu0 %450 }
 0x20e   : > { %v453_v60 = vmul.f32 %v451_v59, %v445_v58 }
 0x210   : > { %v454_v62 = vsub.f32 %v446_v61, %v453_v60 }
 0x212   : > { %v455_v63 = vmul.f32 %v454_v62, %v454_v62 }
 0x214   : > { %v456_v0 = vsel %vm243_vm6, %v455_v63, 0.0 }
 0x215   : > { %457 = vadd.xlane.f32.xlu0 %v456_v0 }
 0x288   : > { %v458_v1 = vpop.xlane.xlu0 %457 }
 0x289   : > { %v459_v2 = vmax.f32 %v458_v1, 1e-24 }
 0x28b   : > { %732 = vrsqrt.f32 %v459_v2  ;;  %vm466_vm9 = vweird.f32 %v459_v2 }
 0x291   : > { %v733_v3 = vpop.eup %732 }
 0x292   : > { %v461_v4 = vmul.f32 %v733_v3, %v459_v2  ;;  %vm467_vm8 = vweird.f32 %v733_v3 }
 0x293   : > { %vm468_vm10 = vmor %vm466_vm9, %vm467_vm8 }
 0x294   : > { %v462_v5 = vmul.f32 %v733_v3, %v461_v4 }
 0x296   : > { %v463_v6 = vmul.f32 0.5, %v462_v5 }
 0x298   : > { %v464_v7 = vsub.f32 1.5, %v463_v6 }
 0x29a   : > { %v465_v8 = vmul.f32 %v733_v3, %v464_v7 }
 0x29c   : > { %v469_v9 = vsel %vm468_vm10, %v733_v3, %v465_v8 }
 0x29d   : > { %v470_v10 = vmul.f32 %v469_v9, %v454_v62 }
 0x29f   : > { %v471_v11 = vmul.f32 %v470_v10, %v470_v10 }
 0x2a1   : > { %v472_v12 = vsel %vm243_vm6, %v471_v11, 0.0 }
 0x2a2   : > { %473 = vadd.xlane.f32.xlu1 %v472_v12 }
 0x315   : > { %v474_v13 = vpop.xlane.xlu1 %473 }
 0x316   : > { %v475_v14 = vrot.slane %v474_v13, 4 }
 0x318   : > { %v476_v15 = vadd.f32 %v475_v14, %v474_v13 }
 0x31a   : > { %v477_v16 = vrot.slane %v476_v15, 2 }
 0x31c   : > { %v478_v17 = vadd.f32 %v477_v16, %v476_v15 }
 0x31e   : > { %v479_v18 = vrot.slane %v478_v17, 1 }
 0x320   : > { %v480_v19 = vadd.f32 %v479_v18, %v478_v17 }
 0x322   : > { %v481_v20 = vmax.f32 %v480_v19, 1e-24 }
 0x324   : > { %734 = vrsqrt.f32 %v481_v20  ;;  %vm488_vm12 = vweird.f32 %v481_v20 }
 0x32a   : > { %v735_v21 = vpop.eup %734 }
 0x32b   : > { %v483_v22 = vmul.f32 %v735_v21, %v481_v20  ;;  %vm489_vm11 = vweird.f32 %v735_v21 }
 0x32c   : > { %vm490_vm13 = vmor %vm488_vm12, %vm489_vm11 }
 0x32d   : > { %v484_v23 = vmul.f32 %v735_v21, %v483_v22 }
 0x32f   : > { %v485_v24 = vmul.f32 0.5, %v484_v23 }
 0x331   : > { %v486_v25 = vsub.f32 1.5, %v485_v24 }
 0x333   : > { %v487_v26 = vmul.f32 %v735_v21, %v486_v25 }
 0x335   : > { %v491_v27 = vsel %vm490_vm13, %v735_v21, %v487_v26 }
 0x336   : > { %v492_v28 = vmul.f32 %v491_v27, %v470_v10 }
 0x338   : > { %493 = vst.msk [vmem:[%s235_s8] sm:$0xff] %vm243_vm6, %v492_v28 }
 0x339   : > { %853 = shalt.err (!%p850_p1)
}
 0x33a   : > { %641 = dma.vmem_to_hbm [thread:$0]  (%p993_p8), %s508_s11, 128, %s510_s22, %s495_s15  }
 0x33b PF: > { %s521_s19 = sand.u32 1, %s892_s12   ;;  %p655_p2 = pnand %p615_p13, %p997_p9 }
 0x33c   : > { %s522_s27 = scalar_lea.sflag [#allocation6], %s521_s19 }
 0x33d   : > { %p656_p4 = pneg %p655_p2 }
 0x33f   : > { %887 = dma.done.wait (%p656_p4), %s522_s27, 128  }
 0x340   : > { %889 = vsyncadd (%p656_p4), %s522_s27, 4294967168  ;;  %s20_s17 = sadd.s32 1, %s912_s17   ;;  %s1116_s12 = smov %s896_s13 }
 0x341   : > { %p17_p6 = scmp.ge.s32.totalorder %s20_s17, 4   ;;  %s1117_s13 = smov %s900_s14 }
 0x342   : > { %s1118_s14 = smov %s1038_s7  ;;  %s1119_s15 = smov %s908_s16 }
 0x343   : > { %s1120_s16 = smov %s1122_s18  ;;  %19 = sbr.rel (!%p17_p6) target bundleno = 9 (0x9), region = 93 }
 0x348   :  { %528 = vsyncpa [#allocation5], 1 }
 0x349   :  { %530 = vsyncpa [#allocation5 + $0x1], 1 }
 0x34a   :  { %531 = vsyncpa [#allocation8], 1 }
 0x34b   :  { %532 = vsyncpa [#allocation6], 1 }
 0x34c   :  { %534 = vsyncpa [#allocation6 + $0x1], 1 }

</bundles_post_ra>
